<compile_context>
chip_gen: v5e
topology: v5e:2x2
jax: 0.10.0
libtpu: 0.0.40
codegen_flags: <defaults>
</compile_context>

<pallas_src>
import functools

import jax
import jax.numpy as jnp
from jax import lax
from jax.experimental import pallas as pl
from jax.experimental.pallas import tpu as pltpu

# ----- model hyper-parameters (small, consistent with the module) -----------
NUM_ANTENNAS = 16
USER_ANGLES = [-15, 15, 30, 45]
NUM_USERS = len(USER_ANGLES)          # 4
HIDDEN = 128                          # module default is 512; small for demo
                                      # (kernel structure is identical for 512)
OUT_DIM = NUM_ANTENNAS * 2            # 32
LN_EPS = 1e-5
LANE = 128
MAX_TILE_B = 2048                     # fat batch tiles amortize ~0.35us/step
VMEM_LIMIT_BYTES = 48 * 1024 * 1024   # plenty for the ~18 MiB working set


def _round_up(x, m):
    return ((x + m - 1) // m) * m


# ---------------------------------------------------------------------------
# Kernel: one batch tile end-to-end (shared MLP -> fused branches -> LayerNorm)
# ---------------------------------------------------------------------------
def fair_beamforming_kernel(
    x_ref,                    # [TB, 256]            bf16 (channel features)
    rho_ref,                  # [TB, 1]              f32
    w1_ref,                   # [256, H]             bf16
    w2_ref,                   # [H, H]               bf16
    wb1_ref,                  # [H, U*H]             bf16
    wb2_ref,                  # [U*H, OUT_PAD=128]   bf16 (pre-scaled by 1/U)
    consts_ref,               # [1, 3H + U*H + 3*OUT_PAD] f32 packed constants
    out_ref,                  # [TB, OUT_PAD]        f32
    *, out_dim,
):
    H = w2_ref.shape[0]
    UH = wb1_ref.shape[1]
    OP = wb2_ref.shape[1]

    # Static, 128-aligned slices of the packed constant vector.
    o = 0
    b1 = consts_ref[:, o:o + H]; o += H
    b2 = consts_ref[:, o:o + H]; o += H
    bb1 = consts_ref[:, o:o + UH]; o += UH
    bb2 = consts_ref[:, o:o + OP]; o += OP
    gamma = consts_ref[:, o:o + OP]; o += OP
    beta = consts_ref[:, o:o + OP]; o += OP
    w1_rho = consts_ref[:, o:o + H]                 # rho row of W1

    x = x_ref[...]
    rho = rho_ref[...]

    # shared_net: Linear -> ReLU -> Linear -> ReLU  (bf16 operands, f32 acc)
    h = jnp.dot(x, w1_ref[...], preferred_element_type=jnp.float32)
    h = h + rho * w1_rho + b1                       # rank-1 VPU update (rho col)
    h = jnp.maximum(h, 0.0).astype(jnp.bfloat16)
    h = jnp.dot(h, w2_ref[...], preferred_element_type=jnp.float32) + b2
    h = jnp.maximum(h, 0.0).astype(jnp.bfloat16)

    # fused user branches: relu(h @ Wb1_cat + bb1_cat) @ (Wb2_cat/U) + mean(bb2)
    hb = jnp.dot(h, wb1_ref[...], preferred_element_type=jnp.float32) + bb1
    hb = jnp.maximum(hb, 0.0).astype(jnp.bfloat16)
    combined = jnp.dot(hb, wb2_ref[...], preferred_element_type=jnp.float32) + bb2

    # LayerNorm over the first `out_dim` lanes.  Padded lanes of `combined`
    # are exactly zero (zero weight columns + zero bias pad), so sum/out_dim
    # is the exact mean; the variance masks the padded lanes.
    lane = lax.broadcasted_iota(jnp.int32, combined.shape, dimension=1)
    valid = lane < out_dim
    inv_n = 1.0 / out_dim
    mean = jnp.sum(combined, axis=-1, keepdims=True) * inv_n
    centered = jnp.where(valid, combined - mean, 0.0)
    var = jnp.sum(centered * centered, axis=-1, keepdims=True) * inv_n
    normed = centered * lax.rsqrt(var + LN_EPS)
    out_ref[...] = (normed * gamma + beta).astype(out_ref.dtype)


# ---------------------------------------------------------------------------
# Wrapper: build inputs, tile batch, call the kernel
# ---------------------------------------------------------------------------
def _build_input(Hc_real, Hc_imag, Hs_real, Hs_imag, rho):
    B = Hc_real.shape[0]
    Hc = jnp.concatenate([Hc_real.reshape(B, -1), Hc_imag.reshape(B, -1)], axis=1)
    Hs = jnp.concatenate([Hs_real.reshape(B, -1), Hs_imag.reshape(B, -1)], axis=1)
    feats = jnp.concatenate([Hc, Hs], axis=1).astype(jnp.float32)       # [B, 256]
    return feats, rho.reshape(-1, 1).astype(jnp.float32)                # [B, 1]


def fair_beamforming_forward(Hc_real, Hc_imag, Hs_real, Hs_imag, rho, kparams):
    feats, rho_col = _build_input(Hc_real, Hc_imag, Hs_real, Hs_imag, rho)
    B, main_in = feats.shape

    hidden = kparams["w1"].shape[1]
    uh = kparams["wb1"].shape[1]
    out_pad = kparams["wb2"].shape[1]
    out_dim = kparams["out_dim"]
    consts_w = kparams["consts"].shape[1]

    # Batch tiling: bound padding waste, 16-row alignment (bf16 sublane pairs),
    # and >= 2 grid steps when B allows it (v7x two-TensorCore split).
    target_tiles = max(pl.cdiv(B, MAX_TILE_B), min(2, pl.cdiv(B, 16)))
    tile_b = _round_up(pl.cdiv(B, target_tiles), 16)
    n_tiles = pl.cdiv(B, tile_b)
    b_pad = n_tiles * tile_b

    x = jnp.pad(feats, ((0, b_pad - B), (0, 0))).astype(jnp.bfloat16)
    rho_p = jnp.pad(rho_col, ((0, b_pad - B), (0, 0))).astype(jnp.float32)

    def const_spec(shape):
        return pl.BlockSpec(shape, lambda i: (0, 0))

    in_specs = [
        pl.BlockSpec((tile_b, main_in), lambda i: (i, 0)),   # x   (batch tiled)
        pl.BlockSpec((tile_b, 1), lambda i: (i, 0)),         # rho (batch tiled)
        const_spec((main_in, hidden)),                       # w1
        const_spec((hidden, hidden)),                        # w2
        const_spec((hidden, uh)),                            # wb1
        const_spec((uh, out_pad)),                           # wb2
        const_spec((1, consts_w)),                           # packed f32 consts
    ]
    out_spec = pl.BlockSpec((tile_b, out_pad), lambda i: (i, 0))

    matmul_elems = main_in * hidden + hidden * hidden + hidden * uh + uh * out_pad
    cost = pl.CostEstimate(
        flops=2 * b_pad * matmul_elems,
        transcendentals=b_pad,                                # one rsqrt per row
        bytes_accessed=(b_pad * main_in * 2 + b_pad * 4 + b_pad * out_pad * 4
                        + matmul_elems * 2 + consts_w * 4),
    )

    out = pl.pallas_call(
        functools.partial(fair_beamforming_kernel, out_dim=out_dim),
        out_shape=jax.ShapeDtypeStruct((b_pad, out_pad), jnp.float32),
        grid=(n_tiles,),
        in_specs=in_specs,
        out_specs=out_spec,
        compiler_params=pltpu.CompilerParams(
            dimension_semantics=("parallel",),
            vmem_limit_bytes=VMEM_LIMIT_BYTES),
        cost_estimate=cost,
    )(x, rho_p,
      kparams["w1"], kparams["w2"], kparams["wb1"], kparams["wb2"],
      kparams["consts"])
    return out[:B, :out_dim]


# ---------------------------------------------------------------------------
# Parameters: module-structured init + kernel-ready packing (fuse / pad / bf16)
# ---------------------------------------------------------------------------
def init_params(key, input_size, hidden=HIDDEN, num_users=NUM_USERS, out_dim=OUT_DIM):
    """PyTorch-style uniform(+-1/sqrt(fan_in)) init; layout mirrors the module."""
    def linear(k, fan_in, fan_out):
        kw, kb = jax.random.split(k)
        bound = 1.0 / jnp.sqrt(jnp.float32(fan_in))
        w = jax.random.uniform(kw, (fan_in, fan_out), jnp.float32, -bound, bound)
        b = jax.random.uniform(kb, (fan_out,), jnp.float32, -bound, bound)
        return w, b

    keys = jax.random.split(key, 2 + 2 * num_users)
    w1, b1 = linear(keys[0], input_size, hidden)
    w2, b2 = linear(keys[1], hidden, hidden)
    wb1, bb1, wb2, bb2 = [], [], [], []
    for u in range(num_users):
        w, b = linear(keys[2 + 2 * u], hidden, hidden)
        wb1.append(w); bb1.append(b)
        w, b = linear(keys[3 + 2 * u], hidden, out_dim)
        wb2.append(w); bb2.append(b)
    return {
        "w1": w1, "b1": b1, "w2": w2, "b2": b2,
        "wb1": jnp.stack(wb1), "bb1": jnp.stack(bb1),   # [U,H,H], [U,H]
        "wb2": jnp.stack(wb2), "bb2": jnp.stack(bb2),   # [U,H,O], [U,O]
        "gamma": jnp.ones((out_dim,), jnp.float32),
        "beta": jnp.zeros((out_dim,), jnp.float32),
    }


def pack_params(params, input_size):
    """Fuse the user branches, split the rho row of W1, pad the output to 128
    lanes, pack all small f32 constants into one vector, cast weights to bf16."""
    hidden = params["w1"].shape[1]
    num_users, _, out_dim = params["wb2"].shape
    main_in = input_size - 1
    assert main_in % LANE == 0, "channel feature width must be lane-aligned"
    out_pad = _round_up(out_dim, LANE)

    w1_main = params["w1"][:main_in]                           # [256, H]
    w1_rho = params["w1"][main_in:].reshape(1, hidden)         # [1, H]

    # block-column concat: wb1_cat[:, u*H:(u+1)*H] == wb1[u]
    wb1_cat = jnp.transpose(params["wb1"], (1, 0, 2)).reshape(hidden, num_users * hidden)
    bb1_cat = params["bb1"].reshape(1, num_users * hidden)
    # block-row stack, mean-over-users folded in, zero-padded to 128 lanes
    wb2_cat = params["wb2"].reshape(num_users * hidden, out_dim) / num_users
    wb2_cat = jnp.pad(wb2_cat, ((0, 0), (0, out_pad - out_dim)))
    bb2_mean = jnp.pad(jnp.mean(params["bb2"], axis=0, keepdims=True),
                       ((0, 0), (0, out_pad - out_dim)))
    gamma = jnp.pad(params["gamma"].reshape(1, out_dim), ((0, 0), (0, out_pad - out_dim)))
    beta = jnp.pad(params["beta"].reshape(1, out_dim), ((0, 0), (0, out_pad - out_dim)))

    consts = jnp.concatenate([
        params["b1"].reshape(1, hidden),
        params["b2"].reshape(1, hidden),
        bb1_cat,
        bb2_mean,
        gamma,
        beta,
        w1_rho,
    ], axis=1).astype(jnp.float32)                             # [1, 3H + U*H + 3*out_pad]

    return {
        "w1": w1_main.astype(jnp.bfloat16),
        "w2": params["w2"].astype(jnp.bfloat16),
        "wb1": wb1_cat.astype(jnp.bfloat16),
        "wb2": wb2_cat.astype(jnp.bfloat16),
        "consts": consts,
        "out_dim": out_dim,
        "out_pad": out_pad,
    }


# ---------------------------------------------------------------------------
# Pure-JAX reference mirroring the PyTorch module (per-branch loop), using the
# same bf16-operand / f32-accumulate matmul precision as the kernel.
# ---------------------------------------------------------------------------
def reference_forward(Hc_real, Hc_imag, Hs_real, Hs_imag, rho, params):
    feats, rho_col = _build_input(Hc_real, Hc_imag, Hs_real, Hs_imag, rho)
    x = jnp.concatenate([feats, rho_col], axis=1)

    def dot_bf16(a, w):
        return jnp.dot(a.astype(jnp.bfloat16), w.astype(jnp.bfloat16),
                       preferred_element_type=jnp.float32)

    h = jnp.maximum(dot_bf16(x, params["w1"]) + params["b1"], 0.0)
    h = jnp.maximum(dot_bf16(h, params["w2"]) + params["b2"], 0.0)
    outs = []
    for u in range(params["wb1"].shape[0]):
        hb = jnp.maximum(dot_bf16(h, params["wb1"][u]) + params["bb1"][u], 0.0)
        outs.append(dot_bf16(hb, params["wb2"][u]) + params["bb2"][u])
    combined = jnp.mean(jnp.stack(outs), axis=0)
    mean = jnp.mean(combined, axis=-1, keepdims=True)
    var = jnp.mean((combined - mean) ** 2, axis=-1, keepdims=True)
    return (combined - mean) / jnp.sqrt(var + LN_EPS) * params["gamma"] + params["beta"]


if __name__ == "__main__":
    B = 2
    key = jax.random.PRNGKey(0)
    k1, k2, k3, k4, k5, kp = jax.random.split(key, 6)

    # channel matrices: [B, num_users, num_antennas]
    Hc_real = jax.random.normal(k1, (B, NUM_USERS, NUM_ANTENNAS), jnp.float32)
    Hc_imag = jax.random.normal(k2, (B, NUM_USERS, NUM_ANTENNAS), jnp.float32)
    Hs_real = jax.random.normal(k3, (B, NUM_USERS, NUM_ANTENNAS), jnp.float32)
    Hs_imag = jax.random.normal(k4, (B, NUM_USERS, NUM_ANTENNAS), jnp.float32)
    rho = jax.random.uniform(k5, (B,), jnp.float32)

    input_size = 2 * NUM_USERS * NUM_ANTENNAS * 2 + 1   # 257 (256 feats + rho)

    params = init_params(kp, input_size)
    kparams = pack_params(params, input_size)

    out = fair_beamforming_forward(Hc_real, Hc_imag, Hs_real, Hs_imag, rho, kparams)
    out = jax.block_until_ready(out)

    ref = reference_forward(Hc_real, Hc_imag, Hs_real, Hs_imag, rho, params)
    assert out.shape == (B, OUT_DIM), out.shape
    max_err = float(jnp.max(jnp.abs(out - ref)))
    assert jnp.allclose(out, ref, atol=1e-2, rtol=1e-2), f"kernel != reference (max err {max_err})"

    print("KERNEL_OK")
</pallas_src>

<mosaic_0001>
module attributes {stable_mosaic.version = 11 : i64} {
  func.func @fair_beamforming_kernel(%arg0: i32, %arg1: memref<16x256xbf16, #tpu.memory_space<vmem>>, %arg2: memref<16x1xf32, #tpu.memory_space<vmem>>, %arg3: memref<256x128xbf16, #tpu.memory_space<vmem>>, %arg4: memref<128x128xbf16, #tpu.memory_space<vmem>>, %arg5: memref<128x512xbf16, #tpu.memory_space<vmem>>, %arg6: memref<512x128xbf16, #tpu.memory_space<vmem>>, %arg7: memref<1x1280xf32, #tpu.memory_space<vmem>>, %arg8: memref<16x128xf32, #tpu.memory_space<vmem>>) attributes {dimension_semantics = [#tpu.dimension_semantics<parallel>], iteration_bounds = array<i64: 1>, scalar_prefetch = 0 : i64, scratch_operands = 0 : i64, tpu.core_type = #tpu.core_type<tc>, window_params = [{transform_indices = @transform_0, window_bounds = array<i64: 16, 256>}, {transform_indices = @transform_1, window_bounds = array<i64: 16, 1>}, {pipeline_mode = #tpu.pipeline_mode<synchronous>, transform_indices = @transform_2, window_bounds = array<i64: 256, 128>}, {pipeline_mode = #tpu.pipeline_mode<synchronous>, transform_indices = @transform_3, window_bounds = array<i64: 128, 128>}, {pipeline_mode = #tpu.pipeline_mode<synchronous>, transform_indices = @transform_4, window_bounds = array<i64: 128, 512>}, {pipeline_mode = #tpu.pipeline_mode<synchronous>, transform_indices = @transform_5, window_bounds = array<i64: 512, 128>}, {pipeline_mode = #tpu.pipeline_mode<synchronous>, transform_indices = @transform_6, window_bounds = array<i64: 1, 1280>}, {transform_indices = @transform_7, window_bounds = array<i64: 16, 128>}]} {
    %c0 = arith.constant 0 : index
    %c0_0 = arith.constant 0 : index
    %0 = vector.load %arg7[%c0, %c0_0] : memref<1x1280xf32, #tpu.memory_space<vmem>>, vector<1x128xf32>
    %c0_1 = arith.constant 0 : index
    %c128 = arith.constant 128 : index
    %1 = vector.load %arg7[%c0_1, %c128] : memref<1x1280xf32, #tpu.memory_space<vmem>>, vector<1x128xf32>
    %c0_2 = arith.constant 0 : index
    %c256 = arith.constant 256 : index
    %2 = vector.load %arg7[%c0_2, %c256] : memref<1x1280xf32, #tpu.memory_space<vmem>>, vector<1x512xf32>
    %c0_3 = arith.constant 0 : index
    %c768 = arith.constant 768 : index
    %3 = vector.load %arg7[%c0_3, %c768] : memref<1x1280xf32, #tpu.memory_space<vmem>>, vector<1x128xf32>
    %c0_4 = arith.constant 0 : index
    %c896 = arith.constant 896 : index
    %4 = vector.load %arg7[%c0_4, %c896] : memref<1x1280xf32, #tpu.memory_space<vmem>>, vector<1x128xf32>
    %c0_5 = arith.constant 0 : index
    %c1024 = arith.constant 1024 : index
    %5 = vector.load %arg7[%c0_5, %c1024] : memref<1x1280xf32, #tpu.memory_space<vmem>>, vector<1x128xf32>
    %c0_6 = arith.constant 0 : index
    %c1152 = arith.constant 1152 : index
    %6 = vector.load %arg7[%c0_6, %c1152] : memref<1x1280xf32, #tpu.memory_space<vmem>>, vector<1x128xf32>
    %c0_7 = arith.constant 0 : index
    %c0_8 = arith.constant 0 : index
    %7 = vector.load %arg1[%c0_7, %c0_8] : memref<16x256xbf16, #tpu.memory_space<vmem>>, vector<16x256xbf16>
    %c0_9 = arith.constant 0 : index
    %c0_10 = arith.constant 0 : index
    %8 = vector.load %arg2[%c0_9, %c0_10] : memref<16x1xf32, #tpu.memory_space<vmem>>, vector<16x1xf32>
    %c0_11 = arith.constant 0 : index
    %c0_12 = arith.constant 0 : index
    %9 = vector.load %arg3[%c0_11, %c0_12] : memref<256x128xbf16, #tpu.memory_space<vmem>>, vector<256x128xbf16>
    %cst = arith.constant dense<0.000000e+00> : vector<16x128xf32>
    %10 = tpu.matmul %7, %9, %cst {dimension_numbers = #tpu.dot_dimension_numbers<[1], [0], [0], [1], [0, 0, 1, 1], [], []>} : vector<16x256xbf16>, vector<256x128xbf16>, vector<16x128xf32> -> vector<16x128xf32>
    %11 = vector.broadcast %8 : vector<16x1xf32> to vector<16x128xf32>
    %12 = vector.broadcast %6 : vector<1x128xf32> to vector<16x128xf32>
    %13 = arith.mulf %11, %12 : vector<16x128xf32>
    %14 = arith.addf %10, %13 : vector<16x128xf32>
    %15 = vector.broadcast %0 : vector<1x128xf32> to vector<16x128xf32>
    %16 = arith.addf %14, %15 : vector<16x128xf32>
    %cst_13 = arith.constant 0.000000e+00 : f32
    %17 = vector.broadcast %cst_13 : f32 to vector<16x128xf32>
    %18 = arith.maximumf %16, %17 : vector<16x128xf32>
    %19 = arith.truncf %18 : vector<16x128xf32> to vector<16x128xbf16>
    %c0_14 = arith.constant 0 : index
    %c0_15 = arith.constant 0 : index
    %20 = vector.load %arg4[%c0_14, %c0_15] : memref<128x128xbf16, #tpu.memory_space<vmem>>, vector<128x128xbf16>
    %cst_16 = arith.constant dense<0.000000e+00> : vector<16x128xf32>
    %21 = tpu.matmul %19, %20, %cst_16 {dimension_numbers = #tpu.dot_dimension_numbers<[1], [0], [0], [1], [0, 0, 1, 1], [], []>} : vector<16x128xbf16>, vector<128x128xbf16>, vector<16x128xf32> -> vector<16x128xf32>
    %22 = vector.broadcast %1 : vector<1x128xf32> to vector<16x128xf32>
    %23 = arith.addf %21, %22 : vector<16x128xf32>
    %cst_17 = arith.constant 0.000000e+00 : f32
    %24 = vector.broadcast %cst_17 : f32 to vector<16x128xf32>
    %25 = arith.maximumf %23, %24 : vector<16x128xf32>
    %26 = arith.truncf %25 : vector<16x128xf32> to vector<16x128xbf16>
    %c0_18 = arith.constant 0 : index
    %c0_19 = arith.constant 0 : index
    %27 = vector.load %arg5[%c0_18, %c0_19] : memref<128x512xbf16, #tpu.memory_space<vmem>>, vector<128x512xbf16>
    %cst_20 = arith.constant dense<0.000000e+00> : vector<16x512xf32>
    %28 = tpu.matmul %26, %27, %cst_20 {dimension_numbers = #tpu.dot_dimension_numbers<[1], [0], [0], [1], [0, 0, 1, 1], [], []>} : vector<16x128xbf16>, vector<128x512xbf16>, vector<16x512xf32> -> vector<16x512xf32>
    %29 = vector.broadcast %2 : vector<1x512xf32> to vector<16x512xf32>
    %30 = arith.addf %28, %29 : vector<16x512xf32>
    %cst_21 = arith.constant 0.000000e+00 : f32
    %31 = vector.broadcast %cst_21 : f32 to vector<16x512xf32>
    %32 = arith.maximumf %30, %31 : vector<16x512xf32>
    %33 = arith.truncf %32 : vector<16x512xf32> to vector<16x512xbf16>
    %c0_22 = arith.constant 0 : index
    %c0_23 = arith.constant 0 : index
    %34 = vector.load %arg6[%c0_22, %c0_23] : memref<512x128xbf16, #tpu.memory_space<vmem>>, vector<512x128xbf16>
    %cst_24 = arith.constant dense<0.000000e+00> : vector<16x128xf32>
    %35 = tpu.matmul %33, %34, %cst_24 {dimension_numbers = #tpu.dot_dimension_numbers<[1], [0], [0], [1], [0, 0, 1, 1], [], []>} : vector<16x512xbf16>, vector<512x128xbf16>, vector<16x128xf32> -> vector<16x128xf32>
    %36 = vector.broadcast %3 : vector<1x128xf32> to vector<16x128xf32>
    %37 = arith.addf %35, %36 : vector<16x128xf32>
    %38 = tpu.iota {dimensions = array<i32: 1>} : vector<16x128xi32>
    %c32_i32 = arith.constant 32 : i32
    %39 = vector.broadcast %c32_i32 : i32 to vector<16x128xi32>
    %40 = arith.cmpi slt, %38, %39 : vector<16x128xi32>
    %cst_25 = arith.constant dense<0.000000e+00> : vector<16xf32>
    %41 = vector.multi_reduction <add>, %37, %cst_25 [1] : vector<16x128xf32> to vector<16xf32>
    %42 = vector.shape_cast %41 : vector<16xf32> to vector<16x1xf32>
    %cst_26 = arith.constant 3.125000e-02 : f32
    %43 = vector.broadcast %cst_26 : f32 to vector<16x1xf32>
    %44 = arith.mulf %42, %43 : vector<16x1xf32>
    %45 = vector.broadcast %44 : vector<16x1xf32> to vector<16x128xf32>
    %46 = arith.subf %37, %45 : vector<16x128xf32>
    %cst_27 = arith.constant 0.000000e+00 : f32
    %47 = vector.broadcast %cst_27 : f32 to vector<16x128xf32>
    %48 = arith.select %40, %46, %47 : vector<16x128xi1>, vector<16x128xf32>
    %49 = arith.mulf %48, %48 : vector<16x128xf32>
    %cst_28 = arith.constant dense<0.000000e+00> : vector<16xf32>
    %50 = vector.multi_reduction <add>, %49, %cst_28 [1] : vector<16x128xf32> to vector<16xf32>
    %51 = vector.shape_cast %50 : vector<16xf32> to vector<16x1xf32>
    %cst_29 = arith.constant 3.125000e-02 : f32
    %52 = vector.broadcast %cst_29 : f32 to vector<16x1xf32>
    %53 = arith.mulf %51, %52 : vector<16x1xf32>
    %cst_30 = arith.constant 9.99999974E-6 : f32
    %54 = vector.broadcast %cst_30 : f32 to vector<16x1xf32>
    %55 = arith.addf %53, %54 : vector<16x1xf32>
    %56 = math.rsqrt %55 : vector<16x1xf32>
    %57 = vector.broadcast %56 : vector<16x1xf32> to vector<16x128xf32>
    %58 = arith.mulf %48, %57 : vector<16x128xf32>
    %59 = vector.broadcast %4 : vector<1x128xf32> to vector<16x128xf32>
    %60 = arith.mulf %58, %59 : vector<16x128xf32>
    %61 = vector.broadcast %5 : vector<1x128xf32> to vector<16x128xf32>
    %62 = arith.addf %60, %61 : vector<16x128xf32>
    %c0_31 = arith.constant 0 : index
    %c0_32 = arith.constant 0 : index
    %63 = vector.load %arg8[%c0_31, %c0_32] : memref<16x128xf32, #tpu.memory_space<vmem>>, vector<16x128xf32>
    tpu.vector_store %arg8[%c0_31, %c0_32], %62 {strides = array<i32>} : memref<16x128xf32, #tpu.memory_space<vmem>>, vector<16x128xf32>,
    return
  }
  func.func @transform_0(%arg0: i32) -> (i32, i32) {
    %c0_i32 = arith.constant 0 : i32
    %c0_i32_0 = arith.constant 0 : i32
    return %arg0, %c0_i32 : i32, i32
  }
  func.func @transform_1(%arg0: i32) -> (i32, i32) {
    %c0_i32 = arith.constant 0 : i32
    %c0_i32_0 = arith.constant 0 : i32
    return %arg0, %c0_i32 : i32, i32
  }
  func.func @transform_2(%arg0: i32) -> (i32, i32) {
    %c0_i32 = arith.constant 0 : i32
    %c0_i32_0 = arith.constant 0 : i32
    %c0_i32_1 = arith.constant 0 : i32
    return %c0_i32, %c0_i32_0 : i32, i32
  }
  func.func @transform_3(%arg0: i32) -> (i32, i32) {
    %c0_i32 = arith.constant 0 : i32
    %c0_i32_0 = arith.constant 0 : i32
    %c0_i32_1 = arith.constant 0 : i32
    return %c0_i32, %c0_i32_0 : i32, i32
  }
  func.func @transform_4(%arg0: i32) -> (i32, i32) {
    %c0_i32 = arith.constant 0 : i32
    %c0_i32_0 = arith.constant 0 : i32
    %c0_i32_1 = arith.constant 0 : i32
    return %c0_i32, %c0_i32_0 : i32, i32
  }
  func.func @transform_5(%arg0: i32) -> (i32, i32) {
    %c0_i32 = arith.constant 0 : i32
    %c0_i32_0 = arith.constant 0 : i32
    %c0_i32_1 = arith.constant 0 : i32
    return %c0_i32, %c0_i32_0 : i32, i32
  }
  func.func @transform_6(%arg0: i32) -> (i32, i32) {
    %c0_i32 = arith.constant 0 : i32
    %c0_i32_0 = arith.constant 0 : i32
    %c0_i32_1 = arith.constant 0 : i32
    return %c0_i32, %c0_i32_0 : i32, i32
  }
  func.func @transform_7(%arg0: i32) -> (i32, i32) {
    %c0_i32 = arith.constant 0 : i32
    %c0_i32_0 = arith.constant 0 : i32
    return %arg0, %c0_i32 : i32, i32
  }
}

</mosaic_0001>

<bundles_post_ra>
// kernel: tpu_custom_call.1
= control target key start
LH: loop header
LB: loop body
LE: loop exit
PB: predicated region body
PF: predicated region fallthrough
CT: control target
= control target key end

     0   :  { %12 = vsyncpa [#allocation3], 0  ;;  %s1764_s0 = inlined_call_operand.vmem [shape: bf16[16,256], index: 0, kind: input, shape index: {}]   ;;  %s1765_s1 = inlined_call_operand.vmem [shape: f32[16,1], index: 1, kind: input, shape index: {}]   ;;  %s1766_s2 = inlined_call_operand.hbm [shape: bf16[256,128], index: 2, kind: input, shape index: {}]   ;;  %s1767_s3 = inlined_call_operand.hbm [shape: bf16[128,128], index: 3, kind: input, shape index: {}]   ;;  %s1768_s4 = inlined_call_operand.hbm [shape: bf16[128,512], index: 4, kind: input, shape index: {}]   ;;  %s1769_s5 = inlined_call_operand.hbm [shape: bf16[512,128], index: 5, kind: input, shape index: {}]   ;;  %s1770_s6 = inlined_call_operand.hbm [shape: f32[1,1280], index: 6, kind: input, shape index: {}]   ;;  %s1771_s7 = inlined_call_operand.hbm [shape: f32[16,128], index: 7, kind: output, shape index: {}]  }
   0x1   :  { %13 = vsyncpa [#allocation6], 0 }
   0x2   :  { %14 = vsyncpa [#allocation9], 0 }
   0x3   :  { %15 = vsyncpa [#allocation4], 0  ;;  %s37_s26 = sshll.u32 %s1767_s3, 4  ;;  %s1675_s27 = smov [#allocation5]   ;;  %s38_s26 = int_to_ptr.hbm [resolvable:$true] %s37_s26 }
   0x4   :  { %s39_s28 = sshll.u32 %s1675_s27, 4  ;;  %s63_s8 = sshll.u32 %s1769_s5, 4  ;;  %s40_s28 = int_to_ptr.vmem [resolvable:$true] %s39_s28  ;;  %s64_s8 = int_to_ptr.hbm [resolvable:$true] %s63_s8 }
   0x5   :  { %s1676_s9 = smov 64   ;;  %s1677_s10 = smov 4  }
   0x6   :  { %45 = dma.hbm_to_vmem [thread:$0]  %s38_s26, 1024, %s40_s28, [#allocation6], %s1676_s9, %s1676_s9, %s1677_s10  }
   0x7   :  { %s1678_s11 = smov [#allocation8]   ;;  %s24_s15 = sshll.u32 %s1766_s2, 4  ;;  %s25_s15 = int_to_ptr.hbm [resolvable:$true] %s24_s15 }
   0x8   :  { %s65_s12 = sshll.u32 %s1678_s11, 4  ;;  %s50_s17 = sshll.u32 %s1768_s4, 4  ;;  %s66_s12 = int_to_ptr.vmem [resolvable:$true] %s65_s12  ;;  %s51_s17 = int_to_ptr.hbm [resolvable:$true] %s50_s17 }
   0x9   :  { %71 = dma.hbm_to_vmem [thread:$0]  %s64_s8, 4096, %s66_s12, [#allocation9], %s1676_s9, %s1676_s9, %s1677_s10  }
   0xa   :  { %s1679_s18 = smov [#allocation2]   ;;  %s1680_s5 = smov [#allocation7]  }
   0xb   :  { %s26_s19 = sshll.u32 %s1679_s18, 4  ;;  %s52_s20 = sshll.u32 %s1680_s5, 4  ;;  %s27_s19 = int_to_ptr.vmem [resolvable:$true] %s26_s19  ;;  %s53_s20 = int_to_ptr.vmem [resolvable:$true] %s52_s20 }
   0xc   :  { %32 = dma.hbm_to_vmem [thread:$0]  %s25_s15, 2048, %s27_s19, [#allocation3], %s1676_s9, %s1676_s9, %s1677_s10  }
   0xd   :  { %s1681_s21 = smov 256   ;;  %s1682_s22 = smov 16  }
   0xe   :  { %58 = dma.hbm_to_vmem [thread:$0]  %s51_s17, 4096, %s53_s20, [#allocation6], %s1681_s21, %s1681_s21, %s1682_s22  }
   0xf   :  { %s77_s24 = sshll.u32 %s1770_s6, 4  ;;  %s1683_s25 = smov [#allocation10]   ;;  %s78_s24 = int_to_ptr.hbm [resolvable:$true] %s77_s24 }
  0x10   :  { %s79_s26 = sshll.u32 %s1683_s25, 4  ;;  %s80_s26 = int_to_ptr.vmem [resolvable:$true] %s79_s26 }
  0x11   :  { %82 = dma.hbm_to_vmem [thread:$0]  %s78_s24, 160, %s80_s26, [#allocation9]  }
  0x12   :  { %1667 = dma.done.wait [#allocation3], 2048  }
  0x13   :  { %1668 = vsyncadd [#allocation3], 4294965248 }
  0x14   :  { %1669 = dma.done.wait [#allocation6], 5120  }
  0x15   :  { %1670 = vsyncadd [#allocation6], 4294962176 }
  0x16   :  { %1671 = dma.done.wait [#allocation9], 4256  }
  0x17   :  { %1672 = vsyncadd [#allocation9], 4294963040  ;;  %v1684_v0 = vmov 0   ;;  %v1418_v1 = vld [vmem:[#allocation2 + $0x38] sm:$0xff]  ;;  %v1417_v3 = vld [vmem:[#allocation2 + $0x30] sm:$0xff]  ;;  %s1034_s3 = sshll.u32 %s1771_s7, 4  ;;  %s1035_s3 = int_to_ptr.hbm [resolvable:$true] %s1034_s3 }
  0x18   :  { %1512 = vset.pattern.permute.xlu0 %v1684_v0  ;;  %v1426_v2 = vld [vmem:[#allocation2 + $0x78] sm:$0xff]  ;;  %267 = vmatpush.bf16.msra.mxu0 %v1418_v1  ;;  %v1425_v4 = vld [vmem:[#allocation2 + $0x70] sm:$0xff]  ;;  %v1416_v5 = vld [vmem:[#allocation2 + $0x28] sm:$0xff]  ;;  %s1686_s16 = smov 128   ;;  %s1687_s17 = smov 8  }
  0x19   :  { %281 = vmatpush.bf16.msra.mxu1 %v1426_v2  ;;  %v1424_v6 = vld [vmem:[#allocation2 + $0x68] sm:$0xff]  ;;  %v112_v7 = vld [vmem:[%s1765_s1] sm:$0xff]  ;;  %v1434_v8 = vld [vmem:[#allocation5 + $0x38] sm:$0xff] }
  0x1a   :  { %148 = vperm.xlu0 %1512, %v112_v7   ;;  %370 = vmatpush.bf16.msra.mxu2 %v1434_v8  ;;  %v1415_v9 = vld [vmem:[#allocation2 + $0x20] sm:$0xff]  ;;  %v113_v11 = vld [vmem:[%s1765_s1 + $0x8] sm:$0xff]  ;;  %v1414_v12 = vld [vmem:[#allocation2 + $0x18] sm:$0xff] }
  0x1b   :  { %v1423_v10 = vld [vmem:[#allocation2 + $0x60] sm:$0xff]  ;;  %v1422_v13 = vld [vmem:[#allocation2 + $0x58] sm:$0xff]  ;;  %v1413_v14 = vld [vmem:[#allocation2 + $0x10] sm:$0xff] }
  0x1c   :  { %268 = vmatpush.bf16.msra.mxu0 %v1417_v3  ;;  %v1421_v15 = vld [vmem:[#allocation2 + $0x50] sm:$0xff]  ;;  %v1412_v16 = vld [vmem:[#allocation2 + $0x8] sm:$0xff]  ;;  %v1411_v18 = vld [vmem:[#allocation2] sm:$0xff] }
  0x1d   :  { %282 = vmatpush.bf16.msra.mxu1 %v1425_v4  ;;  %v1420_v17 = vld [vmem:[#allocation2 + $0x48] sm:$0xff]  ;;  %v1419_v19 = vld [vmem:[#allocation2 + $0x40] sm:$0xff]  ;;  %v1433_v26 = vld [vmem:[#allocation5 + $0x30] sm:$0xff] }
  0x1e   :  { %v1051_v20 = vld [vmem:[%s1764_s0] sm:$0xf]  ;;  %v1410_v21 = vld [vmem:[%s1764_s0 + $0x4] sm:$0xf0]  ;;  %v1409_v22 = vld [vmem:[%s1764_s0 + $0x4] sm:$0xf]  ;;  %371 = vmatpush.bf16.msra.mxu2 %v1433_v26 }
  0x1f   :  { %v1053_v23 = vld [vmem:[%s1764_s0 + $0x8] sm:$0xf0]  ;;  %v1052_v24 = vor.u32 %v1410_v21, %v1051_v20  ;;  %v1431_v28 = vld [vmem:[#allocation5 + $0x20] sm:$0xff]  ;;  %v1430_v29 = vld [vmem:[#allocation5 + $0x18] sm:$0xff]  ;;  %s1685_s0 = smov [#allocation11]  }
  0x20   :  { %269 = vmatpush.bf16.msra.mxu0 %v1416_v5  ;;  %v1056_v25 = vor.u32 %v1409_v22, %v1053_v23  ;;  %v1432_v27 = vld [vmem:[#allocation5 + $0x28] sm:$0xff]  ;;  %v1429_v30 = vld [vmem:[#allocation5 + $0x10] sm:$0xff]  ;;  %v1427_v32 = vld [vmem:[#allocation5] sm:$0xff]  ;;  %s1032_s13 = sshll.u32 %s1685_s0, 4  ;;  %s1033_s13 = int_to_ptr.vmem [resolvable:$true] %s1032_s13 }
  0x21   :  { %283 = vmatpush.bf16.msra.mxu1 %v1424_v6  ;;  %v1428_v31 = vld [vmem:[#allocation5 + $0x8] sm:$0xff]  ;;  %v1267_v33 = vld [vmem:[#allocation7 + $0xe0] sm:$0xf]  ;;  %v1465_v34 = vld [vmem:[#allocation7 + $0xec] sm:$0xf0] }
  0x22   :  { %153 = vperm.xlu0 %1512, %v113_v11   ;;  %372 = vmatpush.bf16.msra.mxu2 %v1432_v27  ;;  %v1463_v35 = vld [vmem:[#allocation7 + $0xe4] sm:$0xf]  ;;  %v1268_v36 = vor.u32 %v1465_v34, %v1267_v33  ;;  %v1269_v37 = vld [vmem:[#allocation7 + $0xf0] sm:$0xf0]  ;;  %v1275_v38 = vld [vmem:[#allocation7 + $0xe8] sm:$0xf] }
  0x23   :  { %v1466_v39 = vld [vmem:[#allocation7 + $0xf4] sm:$0xf0]  ;;  %v1272_v40 = vor.u32 %v1463_v35, %v1269_v37  ;;  %v1464_v42 = vld [vmem:[#allocation7 + $0xec] sm:$0xf]  ;;  %v1277_v43 = vld [vmem:[#allocation7 + $0xf8] sm:$0xf0] }
  0x24   :  { %270 = vmatpush.bf16.msra.mxu0 %v1415_v9  ;;  %v1276_v41 = vor.u32 %v1466_v39, %v1275_v38  ;;  %v1251_v44 = vld [vmem:[#allocation7 + $0xc0] sm:$0xf]  ;;  %588 = vmatpush.bf16.msra.mxu3 %v1268_v36  ;;  %v1280_v45 = vor.u32 %v1464_v42, %v1277_v43  ;;  %v1461_v46 = vld [vmem:[#allocation7 + $0xcc] sm:$0xf0]  ;;  %v1459_v47 = vld [vmem:[#allocation7 + $0xc4] sm:$0xf] }
  0x25   :  { %284 = vmatpush.bf16.msra.mxu1 %v1423_v10  ;;  %v1253_v48 = vld [vmem:[#allocation7 + $0xd0] sm:$0xf0]  ;;  %v1252_v49 = vor.u32 %v1461_v46, %v1251_v44  ;;  %v1259_v51 = vld [vmem:[#allocation7 + $0xc8] sm:$0xf]  ;;  %v1462_v52 = vld [vmem:[#allocation7 + $0xd4] sm:$0xf0] }
  0x26   :  { %373 = vmatpush.bf16.msra.mxu2 %v1431_v28  ;;  %v1256_v50 = vor.u32 %v1459_v47, %v1253_v48  ;;  %v1460_v53 = vld [vmem:[#allocation7 + $0xcc] sm:$0xf]  ;;  %v1260_v54 = vor.u32 %v1462_v52, %v1259_v51  ;;  %v1261_v55 = vld [vmem:[#allocation7 + $0xd8] sm:$0xf0]  ;;  %v1235_v56 = vld [vmem:[#allocation7 + $0xa0] sm:$0xf] }
  0x27   :  { %v1457_v57 = vld [vmem:[#allocation7 + $0xac] sm:$0xf0]  ;;  %v1513_v58 = vld [vmem:[#allocation10 + $0x9] ss:$0 sm:$0xff]  ;;  %v1264_v59 = vor.u32 %v1460_v53, %v1261_v55  ;;  %v1455_v60 = vld [vmem:[#allocation7 + $0xa4] sm:$0xf] }
  0x28   :  { %271 = vmatpush.bf16.msra.mxu0 %v1414_v12  ;;  %v1237_v61 = vld [vmem:[#allocation7 + $0xb0] sm:$0xf0]  ;;  %v1243_v62 = vld [vmem:[#allocation7 + $0xa8] sm:$0xf]  ;;  %589 = vmatpush.bf16.msra.mxu3 %v1252_v49  ;;  %v1236_v0 = vor.u32 %v1457_v57, %v1235_v56  ;;  %v1458_v1 = vld [vmem:[#allocation7 + $0xb4] sm:$0xf0] }
  0x29   :  { %285 = vmatpush.bf16.msra.mxu1 %v1422_v13  ;;  %v1456_v2 = vld [vmem:[#allocation7 + $0xac] sm:$0xf]  ;;  %v1245_v3 = vld [vmem:[#allocation7 + $0xb8] sm:$0xf0]  ;;  %v1240_v4 = vor.u32 %v1455_v60, %v1237_v61  ;;  %v1244_v5 = vor.u32 %v1458_v1, %v1243_v62  ;;  %v1219_v6 = vld [vmem:[#allocation7 + $0x80] sm:$0xf] }
  0x2a   :  { %374 = vmatpush.bf16.msra.mxu2 %v1430_v29  ;;  %v1453_v7 = vld [vmem:[#allocation7 + $0x8c] sm:$0xf0]  ;;  %v1451_v8 = vld [vmem:[#allocation7 + $0x84] sm:$0xf]  ;;  %v1248_v9 = vor.u32 %v1456_v2, %v1245_v3  ;;  %v1221_v10 = vld [vmem:[#allocation7 + $0x90] sm:$0xf0] }
  0x2b   :  { %v1227_v11 = vld [vmem:[#allocation7 + $0x88] sm:$0xf]  ;;  %v1454_v12 = vld [vmem:[#allocation7 + $0x94] sm:$0xf0]  ;;  %v1452_v13 = vld [vmem:[#allocation7 + $0x8c] sm:$0xf] }
  0x2c   :  { %272 = vmatpush.bf16.msra.mxu0 %v1413_v14  ;;  %v1229_v14 = vld [vmem:[#allocation7 + $0x98] sm:$0xf0]  ;;  %590 = vmatpush.bf16.msra.mxu3 %v1236_v0  ;;  %v1514_v26 = vld [vmem:[#allocation10] ss:$0 sm:$0xff]  ;;  %v1449_v37 = vld [vmem:[#allocation7 + $0x6c] sm:$0xf0] }
  0x2d   :  { %286 = vmatpush.bf16.msra.mxu1 %v1421_v15  ;;  %v1220_v15 = vor.u32 %v1453_v7, %v1219_v6  ;;  %v1232_v21 = vor.u32 %v1452_v13, %v1229_v14  ;;  %v1203_v36 = vld [vmem:[#allocation7 + $0x60] sm:$0xf]  ;;  %v1447_v38 = vld [vmem:[#allocation7 + $0x64] sm:$0xf]  ;;  %v1450_v42 = vld [vmem:[#allocation7 + $0x74] sm:$0xf0] }
  0x2e   :  { %375 = vmatpush.bf16.msra.mxu2 %v1429_v30  ;;  %v1204_v39 = vor.u32 %v1449_v37, %v1203_v36  ;;  %v1213_v46 = vld [vmem:[#allocation7 + $0x78] sm:$0xf0]  ;;  %v1187_v48 = vld [vmem:[#allocation7 + $0x40] sm:$0xf]  ;;  %v1445_v49 = vld [vmem:[#allocation7 + $0x4c] sm:$0xf0] }
  0x2f   :  { %v1188_v51 = vor.u32 %v1445_v49, %v1187_v48  ;;  %v1189_v52 = vld [vmem:[#allocation7 + $0x50] sm:$0xf0]  ;;  %v1195_v53 = vld [vmem:[#allocation7 + $0x48] sm:$0xf]  ;;  %v1444_v57 = vld [vmem:[#allocation7 + $0x4c] sm:$0xf] }
  0x30   :  { %273 = vmatpush.bf16.msra.mxu0 %v1412_v16  ;;  %591 = vmatpush.bf16.msra.mxu3 %v1220_v15  ;;  %v1171_v60 = vld [vmem:[#allocation7 + $0x20] sm:$0xf]  ;;  %v1441_v61 = vld [vmem:[#allocation7 + $0x2c] sm:$0xf0]  ;;  %v1439_v62 = vld [vmem:[#allocation7 + $0x24] sm:$0xf] }
  0x31   :  { %287 = vmatpush.bf16.msra.mxu1 %v1420_v17  ;;  %v1224_v17 = vor.u32 %v1451_v8, %v1221_v10  ;;  %v1173_v0 = vld [vmem:[#allocation7 + $0x30] sm:$0xf0]  ;;  %v1179_v1 = vld [vmem:[#allocation7 + $0x28] sm:$0xf]  ;;  %v1442_v2 = vld [vmem:[#allocation7 + $0x34] sm:$0xf0] }
  0x32   :  { %376 = vmatpush.bf16.msra.mxu2 %v1428_v31  ;;  %v1176_v3 = vor.u32 %v1439_v62, %v1173_v0  ;;  %v1181_v6 = vld [vmem:[#allocation7 + $0x38] sm:$0xf0]  ;;  %v1155_v8 = vld [vmem:[#allocation7] sm:$0xf]  ;;  %v1435_v10 = vld [vmem:[#allocation7 + $0x4] sm:$0xf] }
  0x33   :  { %v1163_v13 = vld [vmem:[#allocation7 + $0x8] sm:$0xf]  ;;  %v1438_v14 = vld [vmem:[#allocation7 + $0x14] sm:$0xf0] }
  0x34   :  { %274 = vmatpush.bf16.msra.mxu0 %v1411_v18  ;;  %v1228_v18 = vor.u32 %v1454_v12, %v1227_v11  ;;  %592 = vmatpush.bf16.msra.mxu3 %v1204_v39  ;;  %v1157_v12 = vld [vmem:[#allocation7 + $0x10] sm:$0xf0]  ;;  %v1470_v48 = vld [vmem:[#allocation8 + $0x18] sm:$0xff] }
  0x35   :  { %288 = vmatpush.bf16.msra.mxu1 %v1419_v19  ;;  %v1160_v15 = vor.u32 %v1435_v10, %v1157_v12  ;;  %v1494_v49 = vld [vmem:[#allocation8 + $0xd8] sm:$0xff] }
  0x36   :  { %377 = vmatpush.bf16.msra.mxu2 %v1427_v32 }
  0x37   :  { %275 = vmatmul.bf16.vlgmr.msra.gmra.mxu0 %v1052_v24 }
  0x38   :  { %289 = vmatmul.bf16.vlgmr.msra.gmra.mxu1 %v1056_v25  ;;  %602 = vmatpush.bf16.msrb.mxu0 %v1272_v40  ;;  %v1205_v40 = vld [vmem:[#allocation7 + $0x70] sm:$0xf0] }
  0x39   :  { %616 = vmatpush.bf16.msrb.mxu1 %v1276_v41  ;;  %v1211_v41 = vld [vmem:[#allocation7 + $0x68] sm:$0xf]  ;;  %v1208_v43 = vor.u32 %v1447_v38, %v1205_v40  ;;  %593 = vmatpush.bf16.msra.mxu3 %v1188_v51 }
  0x3a   :  { %630 = vmatpush.bf16.msrb.mxu2 %v1280_v45  ;;  %v1212_v44 = vor.u32 %v1450_v42, %v1211_v41  ;;  %v1448_v45 = vld [vmem:[#allocation7 + $0x6c] sm:$0xf]  ;;  %v1478_v42 = vld [vmem:[#allocation8 + $0x58] sm:$0xff] }
  0x3b   :  { %v1216_v47 = vor.u32 %v1448_v45, %v1213_v46  ;;  %v1495_v45 = vld [vmem:[#allocation8 + $0xe0] sm:$0xff]  ;;  %v1477_v46 = vld [vmem:[#allocation8 + $0x50] sm:$0xff]  ;;  %v1484_v51 = vld [vmem:[#allocation8 + $0x88] sm:$0xff] }
  0x3c   :  { %603 = vmatpush.bf16.msrb.mxu0 %v1256_v50  ;;  %v1443_v50 = vld [vmem:[#allocation7 + $0x44] sm:$0xf] }
  0x3d   :  { %617 = vmatpush.bf16.msrb.mxu1 %v1260_v54  ;;  %v1446_v54 = vld [vmem:[#allocation7 + $0x54] sm:$0xf0]  ;;  %v1192_v55 = vor.u32 %v1443_v50, %v1189_v52  ;;  %v1476_v50 = vld [vmem:[#allocation8 + $0x48] sm:$0xff]  ;;  %v1469_v52 = vld [vmem:[#allocation8 + $0x10] sm:$0xff] }
  0x3e   :  { %631 = vmatpush.bf16.msrb.mxu2 %v1264_v59  ;;  %v1196_v56 = vor.u32 %v1446_v54, %v1195_v53  ;;  %v1493_v53 = vld [vmem:[#allocation8 + $0xd0] sm:$0xff]  ;;  %v1475_v54 = vld [vmem:[#allocation8 + $0x40] sm:$0xff] }
  0x40   :  { %604 = vmatpush.bf16.msrb.mxu0 %v1240_v4  ;;  %v1180_v4 = vor.u32 %v1442_v2, %v1179_v1 }
  0x41   :  { %618 = vmatpush.bf16.msrb.mxu1 %v1244_v5  ;;  %v1440_v5 = vld [vmem:[#allocation7 + $0x2c] sm:$0xf] }
  0x42   :  { %632 = vmatpush.bf16.msrb.mxu2 %v1248_v9  ;;  %v1184_v7 = vor.u32 %v1440_v5, %v1181_v6  ;;  %v1437_v9 = vld [vmem:[#allocation7 + $0xc] sm:$0xf0] }
  0x43   :  { %v1156_v11 = vor.u32 %v1437_v9, %v1155_v8 }
  0x44   :  { %605 = vmatpush.bf16.msrb.mxu0 %v1224_v17  ;;  %v1436_v17 = vld [vmem:[#allocation7 + $0xc] sm:$0xf] }
  0x45   :  { %619 = vmatpush.bf16.msrb.mxu1 %v1228_v18  ;;  %v1165_v18 = vld [vmem:[#allocation7 + $0x18] sm:$0xf0] }
  0x46   :  { %633 = vmatpush.bf16.msrb.mxu2 %v1232_v21  ;;  %v1490_v21 = vld [vmem:[#allocation8 + $0xb8] sm:$0xff] }
  0x48   :  { %606 = vmatpush.bf16.msrb.mxu0 %v1208_v43  ;;  %v1486_v43 = vld [vmem:[#allocation8 + $0x98] sm:$0xff] }
  0x49   :  { %620 = vmatpush.bf16.msrb.mxu1 %v1212_v44  ;;  %v1471_v44 = vld [vmem:[#allocation8 + $0x20] sm:$0xff] }
  0x4a   :  { %634 = vmatpush.bf16.msrb.mxu2 %v1216_v47  ;;  %v1485_v47 = vld [vmem:[#allocation8 + $0x90] sm:$0xff] }
  0x4c   :  { %607 = vmatpush.bf16.msrb.mxu0 %v1192_v55  ;;  %v1483_v55 = vld [vmem:[#allocation8 + $0x80] sm:$0xff] }
  0x4d   :  { %621 = vmatpush.bf16.msrb.mxu1 %v1196_v56  ;;  %v1468_v56 = vld [vmem:[#allocation8 + $0x8] sm:$0xff] }
  0x50   :  { %608 = vmatpush.bf16.msrb.mxu0 %v1176_v3 }
  0x51   :  { %622 = vmatpush.bf16.msrb.mxu1 %v1180_v4 }
  0x54   :  { %609 = vmatpush.bf16.msrb.mxu0 %v1160_v15 }
  0x8c   :  { %v149_v63 = vpop.permute.xlu0 %148 }
  0x8d   :  { %v159_v16 = vmul.f32 %v1513_v58, %v149_v63  ;;  %v1172_v63 = vor.u32 %v1441_v61, %v1171_v60  ;;  %v105_v60 = vld [vmem:[#allocation10 + $0x2] sm:$0xf] }
  0x8e   :  { %v422_v0 = vperm.slane %v105_v60, 2  ;;  %v420_v6 = vperm.slane %v105_v60, 0  ;;  %v423_v9 = vperm.slane %v105_v60, 3 }
  0x8f   :  { %594 = vmatpush.bf16.msra.mxu3 %v1172_v63  ;;  %v421_v63 = vperm.slane %v105_v60, 1 }
  0x93   :  { %595 = vmatpush.bf16.msra.mxu3 %v1156_v11 }
  0x94   :  { %v154_v23 = vpop.permute.xlu0 %153 }
  0x95   :  { %v160_v24 = vmul.f32 %v1513_v58, %v154_v23  ;;  %v1197_v58 = vld [vmem:[#allocation7 + $0x58] sm:$0xf0] }
  0x96   :  { %v1200_v59 = vor.u32 %v1444_v57, %v1197_v58  ;;  %v1498_v23 = vld [vmem:[#allocation8 + $0xf8] sm:$0xff]  ;;  %v1492_v57 = vld [vmem:[#allocation8 + $0xc8] sm:$0xff]  ;;  %v1467_v58 = vld [vmem:[#allocation8] sm:$0xff] }
  0x98   :  { %635 = vmatpush.bf16.msrb.mxu2 %v1200_v59  ;;  %v1491_v59 = vld [vmem:[#allocation8 + $0xc0] sm:$0xff] }
  0x9c   :  { %636 = vmatpush.bf16.msrb.mxu2 %v1184_v7 }
  0xb4   :  { %v276_v19 = vpop.f32.mrf.mxu0 }
  0xb5   :  { %v290_v20 = vpop.f32.mrf.mxu1  ;;  %v277_v22 = vadd.f32 %v276_v19, %v159_v16  ;;  %v1164_v16 = vor.u32 %v1438_v14, %v1163_v13  ;;  %v1168_v19 = vor.u32 %v1436_v17, %v1165_v18 }
  0xb7   :  { %v291_v25 = vadd.f32 %v290_v20, %v277_v22  ;;  %623 = vmatpush.bf16.msrb.mxu1 %v1164_v16  ;;  %637 = vmatpush.bf16.msrb.mxu2 %v1168_v19  ;;  %v1482_v20 = vld [vmem:[#allocation8 + $0x78] sm:$0xff] }
  0xb8   :  { %v1474_v22 = vld [vmem:[#allocation8 + $0x38] sm:$0xff]  ;;  %929 = vmatpush.bf16.msra.mxu0 %v1482_v20 }
  0xb9   :  { %v298_v30 = vadd.f32 %v1514_v26, %v291_v25  ;;  %v1489_v25 = vld [vmem:[#allocation8 + $0xb0] sm:$0xff]  ;;  %915 = vmatpush.bf16.msrb.mxu3 %v1474_v22 }
  0xbb   :  { %v300_v33 = vmax.f32 %v298_v30, 0.0  ;;  %943 = vmatpush.bf16.msra.mxu1 %v1490_v21  ;;  %v1472_v30 = vld [vmem:[#allocation8 + $0x28] sm:$0xff] }
  0xbc   :  { %v278_v27 = vpop.f32.mrf.mxu0 }
  0xbd   :  { %v279_v28 = vadd.f32 %v278_v27, %v160_v24  ;;  %v292_v29 = vpop.f32.mrf.mxu1  ;;  %v1481_v24 = vld [vmem:[#allocation8 + $0x70] sm:$0xff] }
  0xbe   :  { %v1497_v27 = vld [vmem:[#allocation8 + $0xf0] sm:$0xff]  ;;  %930 = vmatpush.bf16.msra.mxu0 %v1481_v24 }
  0xbf   :  { %v293_v31 = vadd.f32 %v292_v29, %v279_v28  ;;  %944 = vmatpush.bf16.msra.mxu1 %v1489_v25  ;;  %v1480_v28 = vld [vmem:[#allocation8 + $0x68] sm:$0xff] }
  0xc0   :  { %v1488_v29 = vld [vmem:[#allocation8 + $0xa8] sm:$0xff] }
  0xc1   :  { %v299_v32 = vadd.f32 %v1514_v26, %v293_v31  ;;  %v1473_v26 = vld [vmem:[#allocation8 + $0x30] sm:$0xff]  ;;  %v1496_v31 = vld [vmem:[#allocation8 + $0xe8] sm:$0xff] }
  0xc2   :  { %916 = vmatpush.bf16.msrb.mxu3 %v1473_v26  ;;  %931 = vmatpush.bf16.msra.mxu0 %v1480_v28 }
  0xc3   :  { %v301_v34 = vmax.f32 %v299_v32, 0.0  ;;  %945 = vmatpush.bf16.msra.mxu1 %v1488_v29  ;;  %v1479_v32 = vld [vmem:[#allocation8 + $0x60] sm:$0xff] }
  0xc4   :  { %v1516_v29 = vld [vmem:[#allocation10 + $0x6] ss:$0 sm:$0xff] }
  0xc5   :  { %v302_v35 = vpack.c.bf16 %v301_v34, %v300_v33  ;;  %v1487_v33 = vld [vmem:[#allocation8 + $0xa0] sm:$0xff] }
  0xc6   :  { %917 = vmatpush.bf16.msrb.mxu3 %v1472_v30  ;;  %932 = vmatpush.bf16.msra.mxu0 %v1479_v32 }
  0xc7   :  { %378 = vmatmul.bf16.vlgmr.msra.gmra.mxu2 %v302_v35  ;;  %946 = vmatpush.bf16.msra.mxu1 %v1487_v33  ;;  %v1515_v35 = vld [vmem:[#allocation10 + $0x1] ss:$0 sm:$0xff] }
  0xc8   :  { %957 = vmatpush.bf16.msra.mxu2 %v1498_v23 }
  0xca   :  { %933 = vmatpush.bf16.msra.mxu0 %v1478_v42  ;;  %918 = vmatpush.bf16.msrb.mxu3 %v1471_v44 }
  0xcb   :  { %947 = vmatpush.bf16.msra.mxu1 %v1486_v43 }
  0xcc   :  { %958 = vmatpush.bf16.msra.mxu2 %v1497_v27 }
  0xce   :  { %934 = vmatpush.bf16.msra.mxu0 %v1477_v46  ;;  %919 = vmatpush.bf16.msrb.mxu3 %v1470_v48  ;;  %v971_v46 = vlaneseq }
  0xcf   :  { %948 = vmatpush.bf16.msra.mxu1 %v1485_v47 }
  0xd0   :  { %959 = vmatpush.bf16.msra.mxu2 %v1496_v31  ;;  %v972_v47 = vand.u32 127, %v971_v46 }
  0xd2   :  { %935 = vmatpush.bf16.msra.mxu0 %v1476_v50  ;;  %920 = vmatpush.bf16.msrb.mxu3 %v1469_v52  ;;  %vm973_vm0 = vcmp.lt.s32.totalorder %v972_v47, 32 }
  0xd3   :  { %949 = vmatpush.bf16.msra.mxu1 %v1484_v51 }
  0xd4   :  { %960 = vmatpush.bf16.msra.mxu2 %v1495_v45 }
  0xd6   :  { %936 = vmatpush.bf16.msra.mxu0 %v1475_v54  ;;  %921 = vmatpush.bf16.msrb.mxu3 %v1468_v56 }
  0xd7   :  { %950 = vmatpush.bf16.msra.mxu1 %v1483_v55 }
  0xd8   :  { %961 = vmatpush.bf16.msra.mxu2 %v1494_v49 }
  0xda   :  { %922 = vmatpush.bf16.msrb.mxu3 %v1467_v58 }
  0xdc   :  { %962 = vmatpush.bf16.msra.mxu2 %v1493_v53 }
  0xe0   :  { %963 = vmatpush.bf16.msra.mxu2 %v1492_v57 }
  0xe4   :  { %964 = vmatpush.bf16.msra.mxu2 %v1491_v59 }
 0x14a   :  { %v379_v34 = vpop.f32.mrf.mxu2 }
 0x14b   :  { %v380_v36 = vadd.f32 %v1515_v35, %v379_v34 }
 0x14d   :  { %v384_v39 = vmax.f32 %v380_v36, 0.0 }
 0x152   :  { %v381_v37 = vpop.f32.mrf.mxu2 }
 0x153   :  { %v382_v38 = vadd.f32 %v1515_v35, %v381_v37 }
 0x155   :  { %v385_v40 = vmax.f32 %v382_v38, 0.0 }
 0x157   :  { %v386_v41 = vpack.c.bf16 %v385_v40, %v384_v39 }
 0x159   :  { %596 = vmatmul.bf16.vlgmr.msra.gmra.mxu3 %v386_v41  ;;  %610 = vmatmul.bf16.vlgmr.msrb.gmra.mxu0 %v386_v41 }
 0x15a   :  { %624 = vmatmul.bf16.vlgmr.msrb.gmra.mxu1 %v386_v41  ;;  %638 = vmatmul.bf16.vlgmr.msrb.gmra.mxu2 %v386_v41 }
 0x1d6   :  { %v611_v61 = vpop.f32.mrf.mxu0 }
 0x1d7   :  { %v625_v62 = vpop.f32.mrf.mxu1  ;;  %v612_v2 = vadd.f32 %v611_v61, %v421_v63 }
 0x1d8   :  { %v626_v4 = vadd.f32 %v625_v62, %v422_v0 }
 0x1d9   :  { %v645_v11 = vmax.f32 %v612_v2, 0.0 }
 0x1da   :  { %v646_v13 = vmax.f32 %v626_v4, 0.0 }
 0x1dc   :  { %v597_v1 = vpop.f32.mrf.mxu3 }
 0x1dd   :  { %v639_v3 = vpop.f32.mrf.mxu2  ;;  %v598_v15 = vadd.f32 %v597_v1, %v420_v6 }
 0x1de   :  { %v613_v5 = vpop.f32.mrf.mxu0  ;;  %v640_v17 = vadd.f32 %v639_v3, %v423_v9 }
 0x1df   :  { %v614_v7 = vadd.f32 %v613_v5, %v421_v63  ;;  %v627_v8 = vpop.f32.mrf.mxu1  ;;  %v644_v23 = vmax.f32 %v598_v15, 0.0 }
 0x1e0   :  { %v628_v10 = vadd.f32 %v627_v8, %v422_v0  ;;  %v647_v25 = vmax.f32 %v640_v17, 0.0  ;;  %v1517_v8 = vld [vmem:[#allocation10 + $0x7] ss:$0 sm:$0xff] }
 0x1e1   :  { %v649_v12 = vmax.f32 %v614_v7, 0.0 }
 0x1e2   :  { %v650_v14 = vmax.f32 %v628_v10, 0.0 }
 0x1e3   :  { %v653_v16 = vpack.c.bf16 %v649_v12, %v645_v11  ;;  %v1518_v12 = vld [vmem:[#allocation10 + $0x8] ss:$0 sm:$0xff] }
 0x1e4   :  { %v654_v18 = vpack.c.bf16 %v650_v14, %v646_v13  ;;  %v599_v19 = vpop.f32.mrf.mxu3 }
 0x1e5   :  { %v600_v20 = vadd.f32 %v599_v19, %v420_v6  ;;  %v641_v21 = vpop.f32.mrf.mxu2  ;;  %937 = vmatmul.bf16.vlgmr.msra.gmra.mxu0 %v653_v16 }
 0x1e6   :  { %v642_v22 = vadd.f32 %v641_v21, %v423_v9  ;;  %951 = vmatmul.bf16.vlgmr.msra.gmra.mxu1 %v654_v18 }
 0x1e7   :  { %v648_v24 = vmax.f32 %v600_v20, 0.0 }
 0x1e8   :  { %v651_v26 = vmax.f32 %v642_v22, 0.0 }
 0x1e9   :  { %v652_v27 = vpack.c.bf16 %v648_v24, %v644_v23 }
 0x1ea   :  { %v655_v28 = vpack.c.bf16 %v651_v26, %v647_v25 }
 0x1eb   :  { %923 = vmatmul.bf16.vlgmr.msrb.gmra.mxu3 %v652_v27 }
 0x1ec   :  { %965 = vmatmul.bf16.vlgmr.msra.gmra.mxu2 %v655_v28 }
 0x262   :  { %v938_v30 = vpop.f32.mrf.mxu0 }
 0x263   :  { %v952_v33 = vpop.f32.mrf.mxu1 }
 0x26a   :  { %v940_v40 = vpop.f32.mrf.mxu0 }
 0x26b   :  { %v954_v42 = vpop.f32.mrf.mxu1 }
 0x26e   :  { %v924_v31 = vpop.f32.mrf.mxu3 }
 0x26f   :  { %v925_v32 = vadd.f32 %v1516_v29, %v924_v31  ;;  %v966_v35 = vpop.f32.mrf.mxu2 }
 0x271   :  { %v939_v34 = vadd.f32 %v938_v30, %v925_v32 }
 0x273   :  { %v953_v36 = vadd.f32 %v952_v33, %v939_v34 }
 0x275   :  { %v967_v37 = vadd.f32 %v966_v35, %v953_v36 }
 0x276   :  { %v926_v38 = vpop.f32.mrf.mxu3 }
 0x277   :  { %v927_v39 = vadd.f32 %v1516_v29, %v926_v38  ;;  %974 = vadd.xlane.f32.xlu1 %v967_v37  ;;  %v968_v44 = vpop.f32.mrf.mxu2 }
 0x279   :  { %v941_v41 = vadd.f32 %v940_v40, %v927_v39 }
 0x27b   :  { %v955_v43 = vadd.f32 %v954_v42, %v941_v41 }
 0x27d   :  { %v969_v45 = vadd.f32 %v968_v44, %v955_v43 }
 0x27f   :  { %976 = vadd.xlane.f32.xlu1 %v969_v45 }
 0x2ea   :  { %v975_v48 = vpop.xlane.xlu1 %974 }
 0x2eb   :  { %v978_v49 = vmul.f32 0.03125, %v975_v48 }
 0x2ed   :  { %v980_v50 = vsub.f32 %v967_v37, %v978_v49 }
 0x2ef   :  { %v982_v51 = vsel %vm973_vm0, %v980_v50, 0.0 }
 0x2f0   :  { %v984_v52 = vmul.f32 %v982_v51, %v982_v51 }
 0x2f2   :  { %986 = vadd.xlane.f32.xlu2 %v984_v52  ;;  %v977_v53 = vpop.xlane.xlu1 %976 }
 0x2f3   :  { %v979_v54 = vmul.f32 0.03125, %v977_v53 }
 0x2f5   :  { %v981_v55 = vsub.f32 %v969_v45, %v979_v54 }
 0x2f7   :  { %v983_v56 = vsel %vm973_vm0, %v981_v55, 0.0 }
 0x2f8   :  { %v985_v57 = vmul.f32 %v983_v56, %v983_v56 }
 0x2fa   :  { %988 = vadd.xlane.f32.xlu2 %v985_v57 }
 0x365   :  { %v987_v58 = vpop.xlane.xlu2 %986 }
 0x366   :  { %v990_v59 = vmul.f32 0.03125, %v987_v58 }
 0x368   :  { %v992_v60 = vadd.f32 1e-05, %v990_v59 }
 0x36a   :  { %1519 = vrsqrt.f32 %v992_v60  ;;  %vm1000_vm2 = vweird.f32 %v992_v60 }
 0x36d   :  { %v989_v61 = vpop.xlane.xlu2 %988 }
 0x36e   :  { %v991_v62 = vmul.f32 0.03125, %v989_v61 }
 0x370   :  { %v1520_v63 = vpop.eup %1519  ;;  %v993_v0 = vadd.f32 1e-05, %v991_v62 }
 0x371   :  { %v995_v1 = vmul.f32 %v1520_v63, %v992_v60  ;;  %vm1001_vm1 = vweird.f32 %v1520_v63 }
 0x372   :  { %1521 = vrsqrt.f32 %v993_v0  ;;  %vm1002_vm3 = vmor %vm1000_vm2, %vm1001_vm1  ;;  %vm1010_vm5 = vweird.f32 %v993_v0 }
 0x373   :  { %v996_v2 = vmul.f32 %v1520_v63, %v995_v1 }
 0x375   :  { %v997_v3 = vmul.f32 0.5, %v996_v2 }
 0x377   :  { %v998_v4 = vsub.f32 1.5, %v997_v3 }
 0x378   :  { %v1522_v5 = vpop.eup %1521 }
 0x379   :  { %v999_v6 = vmul.f32 %v1520_v63, %v998_v4  ;;  %v1005_v7 = vmul.f32 %v1522_v5, %v993_v0  ;;  %vm1011_vm4 = vweird.f32 %v1522_v5 }
 0x37a   :  { %vm1012_vm6 = vmor %vm1010_vm5, %vm1011_vm4 }
 0x37b   :  { %v1003_v9 = vsel %vm1002_vm3, %v1520_v63, %v999_v6  ;;  %v1006_v10 = vmul.f32 %v1522_v5, %v1005_v7 }
 0x37c   :  { %v1014_v11 = vmul.f32 %v1003_v9, %v982_v51 }
 0x37d   :  { %v1007_v13 = vmul.f32 0.5, %v1006_v10 }
 0x37e   :  { %v1019_v14 = vmul.f32 %v1517_v8, %v1014_v11 }
 0x37f   :  { %v1008_v15 = vsub.f32 1.5, %v1007_v13 }
 0x380   :  { %v1024_v16 = vadd.f32 %v1518_v12, %v1019_v14 }
 0x381   :  { %v1009_v17 = vmul.f32 %v1522_v5, %v1008_v15 }
 0x382   :  { %1026 = vst [vmem:[#allocation11] sm:$0xff] %v1024_v16 }
 0x383   :  { %v1013_v18 = vsel %vm1012_vm6, %v1522_v5, %v1009_v17 }
 0x384   :  { %v1015_v19 = vmul.f32 %v1013_v18, %v983_v56 }
 0x386   :  { %v1020_v20 = vmul.f32 %v1517_v8, %v1015_v19 }
 0x388   :  { %v1025_v21 = vadd.f32 %v1518_v12, %v1020_v20 }
 0x38a   :  { %1027 = vst [vmem:[#allocation11 + $0x8] sm:$0xff] %v1025_v21 }
 0x38b   :  { %1040 = dma.vmem_to_hbm [thread:$0]  %s1033_s13, 256, %s1035_s3, [#allocation4], %s1686_s16, %s1686_s16, %s1687_s17  }
 0x38c   :  { %1673 = dma.done.wait [#allocation4], 256  }
 0x38d   :  { %1674 = vsyncadd [#allocation4], 4294967040 }
 0x38e   :  { %1045 = vsyncpa [#allocation3], 1 }
 0x38f   :  { %1046 = vsyncpa [#allocation6], 1 }
 0x390   :  { %1047 = vsyncpa [#allocation9], 1 }
 0x391   :  { %1048 = vsyncpa [#allocation4], 1 }

</bundles_post_ra>
